<compile_context>
chip_gen: v7x
topology: tpu7x:2x2x1
jax: 0.10.0
libtpu: 0.0.40
codegen_flags: <defaults>
</compile_context>

<pallas_src>
import jax
import jax.numpy as jnp
from jax.experimental import pallas as pl
from jax.experimental.pallas import tpu as pltpu


def _round_up(a, b):
    return (a + b - 1) // b * b


def ensemble_mlp_kernel(x_ref, w1_ref, b1_ref, w2_ref, b2_ref, w3_ref, b3_ref, o_ref):
    """One grid step == one tile of rows, ALL ensemble members fused.

    Shapes (per tile):
      x_ref : (tn, dx)             w1_ref: (dx, dhh_pad)        b1_ref: (1, dhh_pad)
      w2_ref: (dhh_pad, dhh_pad)   b2_ref: (1, dhh_pad)
      w3_ref: (n_models, dhh_pad, dx)   b3_ref: (n_models, 1, dx)
      o_ref : (n_models, tn, dx)
    """
    wdt = w1_ref.dtype                        # bf16 (default) or f32 matmul-input dtype
    x = x_ref[...].astype(wdt)                # (tn, dx)

    # Layer 1: x @ [W1_0 | W1_1 | ... | 0-pad] -> (tn, dhh_pad), f32 accumulate.
    h1 = jnp.dot(x, w1_ref[...], preferred_element_type=jnp.float32) + b1_ref[...]
    h1 = jnp.maximum(h1, 0.0)                 # ReLU in f32 (zero-padded lanes stay 0)

    # Layer 2: block-diagonal keeps models independent -> (tn, dhh_pad).
    h2 = jnp.dot(h1.astype(wdt), w2_ref[...],
                 preferred_element_type=jnp.float32) + b2_ref[...]
    h2 = jnp.maximum(h2, 0.0).astype(wdt)

    # Layer 3: one small matmul per model, written straight to its output slice.
    n_models = o_ref.shape[0]                 # static
    for m in range(n_models):
        mu_m = jnp.dot(h2, w3_ref[m], preferred_element_type=jnp.float32) + b3_ref[m]
        o_ref[m] = mu_m.astype(o_ref.dtype)   # (tn, dx) store — exact bytes, no padding


def _pack_params(params, dhh_pad, matmul_dtype):
    """Pack per-model weights into fused lane-major matrices (biases stay f32)."""
    n_models, dx, dh = params["w1"].shape
    dhh = n_models * dh
    pad = dhh_pad - dhh

    # W1: (n, dx, dh) -> (dx, n*dh), lane-padded to dhh_pad.
    w1c = params["w1"].transpose(1, 0, 2).reshape(dx, dhh)
    w1c = jnp.pad(w1c, ((0, 0), (0, pad)))
    b1c = jnp.pad(params["b1"].reshape(1, dhh), ((0, 0), (0, pad)))

    # W2: block-diagonal (models independent), padded to (dhh_pad, dhh_pad).
    w2bd = jax.scipy.linalg.block_diag(*[params["w2"][i] for i in range(n_models)])
    w2bd = jnp.pad(w2bd, ((0, pad), (0, pad)))
    b2c = jnp.pad(params["b2"].reshape(1, dhh), ((0, 0), (0, pad)))

    # W3: per-model expanded column block of the block-diagonal:
    #     w3e[m, m*dh:(m+1)*dh, :] = w3_m, everything else 0 (rows beyond dhh too).
    w3e = jnp.zeros((n_models, dhh_pad, dx), params["w3"].dtype)
    for m in range(n_models):
        w3e = w3e.at[m, m * dh:(m + 1) * dh, :].set(params["w3"][m])
    b3e = params["b3"].reshape(n_models, 1, dx)

    return (w1c.astype(matmul_dtype), b1c.astype(jnp.float32),
            w2bd.astype(matmul_dtype), b2c.astype(jnp.float32),
            w3e.astype(matmul_dtype), b3e.astype(jnp.float32))


def ensemble_rnn_forward(x, params, *, tile_n=1024, use_bf16_matmul=True):
    """EnsembleRNN.forward: returns (n_models, *x.shape[:-1], dx)."""
    lead = x.shape[:-1]
    dx = x.shape[-1]
    xf = x.reshape(-1, dx)
    N = xf.shape[0]
    n_models, _, dh = params["w1"].shape

    dhh_pad = _round_up(n_models * dh, 128)       # lane-dense hidden width
    matmul_dtype = jnp.bfloat16 if use_bf16_matmul else x.dtype
    w1c, b1c, w2bd, b2c, w3e, b3e = _pack_params(params, dhh_pad, matmul_dtype)

    # Row tile: multiple of 8 (or == N when N < 8); guarantee >= 2 grid steps so
    # the "parallel" axis splits evenly across both v7x TensorCores at small N.
    if N <= 8:
        tn = N
    else:
        tn = min(tile_n, max(8, _round_up(pl.cdiv(N, 2), 8)))
    grid = (pl.cdiv(N, tn),)

    # Advisory cost + explicit VMEM budget (weights are pipeline double-buffered).
    flops = 2 * N * (dx * dhh_pad + dhh_pad * dhh_pad + n_models * dhh_pad * dx)
    weight_bytes = sum(a.size * a.dtype.itemsize
                       for a in (w1c, b1c, w2bd, b2c, w3e, b3e))
    out_bytes = n_models * N * dx * x.dtype.itemsize
    bytes_accessed = xf.size * xf.dtype.itemsize + weight_bytes + out_bytes
    vmem_est = (2 * weight_bytes                          # double-buffered weights
                + 4 * tn * dhh_pad * 4                    # live h1/h2 temporaries
                + 2 * tn * dx * xf.dtype.itemsize         # input tile x2
                + 2 * n_models * tn * dx * x.dtype.itemsize  # output tile x2
                + (4 << 20))                              # slack
    vmem_limit = max(32 << 20, min(vmem_est, 64 << 20))

    out = pl.pallas_call(
        ensemble_mlp_kernel,
        out_shape=jax.ShapeDtypeStruct((n_models, N, dx), x.dtype),
        grid_spec=pltpu.PrefetchScalarGridSpec(
            num_scalar_prefetch=0,
            grid=grid,
            in_specs=[
                pl.BlockSpec((tn, dx), lambda i: (i, 0)),              # x rows (tiled)
                pl.BlockSpec((dx, dhh_pad), lambda i: (0, 0)),         # W1cat
                pl.BlockSpec((1, dhh_pad), lambda i: (0, 0)),          # b1cat
                pl.BlockSpec((dhh_pad, dhh_pad), lambda i: (0, 0)),    # W2 block-diag
                pl.BlockSpec((1, dhh_pad), lambda i: (0, 0)),          # b2cat
                pl.BlockSpec((n_models, dhh_pad, dx), lambda i: (0, 0, 0)),  # W3 per-model
                pl.BlockSpec((n_models, 1, dx), lambda i: (0, 0, 0)),  # b3 per-model
            ],
            out_specs=pl.BlockSpec((n_models, tn, dx), lambda i: (0, i, 0)),
        ),
        compiler_params=pltpu.CompilerParams(
            dimension_semantics=("parallel",),
            vmem_limit_bytes=int(vmem_limit)),
        cost_estimate=pl.CostEstimate(
            flops=flops, transcendentals=0, bytes_accessed=int(bytes_accessed)),
    )(xf, w1c, b1c, w2bd, b2c, w3e, b3e)

    # (n_models, N, dx) -> (n_models, *lead, dx): contiguous reshape, no extra HBM pass.
    return out.reshape((n_models,) + lead + (dx,))


def init_params(key, n_models, dx, dh, dtype=jnp.float32):
    """Deterministic synthetic init (mimics nn.Linear uniform(-1/sqrt(fan_in), ...))."""
    ks = jax.random.split(key, 6)

    def unif(k, shape, fan_in):
        bound = 1.0 / jnp.sqrt(jnp.asarray(fan_in, dtype))
        return jax.random.uniform(k, shape, dtype, -bound, bound)

    return {
        "w1": unif(ks[0], (n_models, dx, dh), dx),
        "b1": unif(ks[1], (n_models, 1, dh), dx),
        "w2": unif(ks[2], (n_models, dh, dh), dh),
        "b2": unif(ks[3], (n_models, 1, dh), dh),
        "w3": unif(ks[4], (n_models, dh, dx), dh),
        "b3": unif(ks[5], (n_models, 1, dx), dh),
    }


def ensemble_rnn_forward_ref(x, params):
    """Pure-JAX reference of EnsembleRNN.forward for correctness checking."""
    def one_model(w1, b1, w2, b2, w3, b3):
        h1 = jnp.maximum(x @ w1 + b1[0], 0.0)
        h2 = jnp.maximum(h1 @ w2 + b2[0], 0.0)
        return h2 @ w3 + b3[0]
    return jax.vmap(one_model)(params["w1"], params["b1"], params["w2"],
                               params["b2"], params["w3"], params["b3"])


if __name__ == "__main__":
    # Small shapes consistent with the module: state dim dx, hidden dh,
    # ensemble of n_models, input of shape (batch, seq, dx).
    n_models, dx, dh = 3, 16, 32
    batch, seq = 2, 8

    key = jax.random.PRNGKey(0)
    kx, kp = jax.random.split(key)
    x = jax.random.normal(kx, (batch, seq, dx), dtype=jnp.float32)
    params = init_params(kp, n_models, dx, dh)

    ref = ensemble_rnn_forward_ref(x, params)

    # Exact f32 matmul path: bit-level comparable to the reference.
    out_f32 = jax.block_until_ready(
        ensemble_rnn_forward(x, params, use_bf16_matmul=False))
    assert out_f32.shape == (n_models, batch, seq, dx), out_f32.shape
    assert jnp.allclose(out_f32, ref, atol=1e-5, rtol=1e-5), "f32 path mismatch"

    # Default (bf16 matmul inputs, f32 accumulation): looser tolerance.
    out_bf16 = jax.block_until_ready(ensemble_rnn_forward(x, params))
    assert out_bf16.shape == (n_models, batch, seq, dx), out_bf16.shape
    assert jnp.allclose(out_bf16, ref, atol=2e-2, rtol=2e-2), "bf16 path mismatch"

    print("KERNEL_OK")
</pallas_src>

<mosaic_0001>
module attributes {stable_mosaic.version = 11 : i64} {
  func.func @ensemble_mlp_kernel(%arg0: i32, %arg1: memref<8x16xf32, #tpu.memory_space<vmem>>, %arg2: memref<16x128xf32, #tpu.memory_space<vmem>>, %arg3: memref<1x128xf32, #tpu.memory_space<vmem>>, %arg4: memref<128x128xf32, #tpu.memory_space<vmem>>, %arg5: memref<1x128xf32, #tpu.memory_space<vmem>>, %arg6: memref<3x128x16xf32, #tpu.memory_space<vmem>>, %arg7: memref<3x1x16xf32, #tpu.memory_space<vmem>>, %arg8: memref<3x8x16xf32, #tpu.memory_space<vmem>>) attributes {dimension_semantics = [#tpu.dimension_semantics<parallel>], iteration_bounds = array<i64: 2>, scalar_prefetch = 0 : i64, scratch_operands = 0 : i64, tpu.core_type = #tpu.core_type<tc>, window_params = [{transform_indices = @transform_0, window_bounds = array<i64: 8, 16>}, {pipeline_mode = #tpu.pipeline_mode<synchronous>, transform_indices = @transform_1, window_bounds = array<i64: 16, 128>}, {pipeline_mode = #tpu.pipeline_mode<synchronous>, transform_indices = @transform_2, window_bounds = array<i64: 1, 128>}, {pipeline_mode = #tpu.pipeline_mode<synchronous>, transform_indices = @transform_3, window_bounds = array<i64: 128, 128>}, {pipeline_mode = #tpu.pipeline_mode<synchronous>, transform_indices = @transform_4, window_bounds = array<i64: 1, 128>}, {pipeline_mode = #tpu.pipeline_mode<synchronous>, transform_indices = @transform_5, window_bounds = array<i64: 3, 128, 16>}, {pipeline_mode = #tpu.pipeline_mode<synchronous>, transform_indices = @transform_6, window_bounds = array<i64: 3, 1, 16>}, {transform_indices = @transform_7, window_bounds = array<i64: 3, 8, 16>}]} {
    %c0 = arith.constant 0 : index
    %c0_0 = arith.constant 0 : index
    %0 = vector.load %arg1[%c0, %c0_0] : memref<8x16xf32, #tpu.memory_space<vmem>>, vector<8x16xf32>
    %c0_1 = arith.constant 0 : index
    %c0_2 = arith.constant 0 : index
    %1 = vector.load %arg2[%c0_1, %c0_2] : memref<16x128xf32, #tpu.memory_space<vmem>>, vector<16x128xf32>
    %cst = arith.constant dense<0.000000e+00> : vector<8x128xf32>
    %2 = tpu.matmul %0, %1, %cst {dimension_numbers = #tpu.dot_dimension_numbers<[1], [0], [0], [1], [0, 0, 1, 1], [], []>} : vector<8x16xf32>, vector<16x128xf32>, vector<8x128xf32> -> vector<8x128xf32>
    %c0_3 = arith.constant 0 : index
    %c0_4 = arith.constant 0 : index
    %3 = vector.load %arg3[%c0_3, %c0_4] : memref<1x128xf32, #tpu.memory_space<vmem>>, vector<1x128xf32>
    %4 = vector.broadcast %3 : vector<1x128xf32> to vector<8x128xf32>
    %5 = arith.addf %2, %4 : vector<8x128xf32>
    %cst_5 = arith.constant 0.000000e+00 : f32
    %6 = vector.broadcast %cst_5 : f32 to vector<8x128xf32>
    %7 = arith.maximumf %5, %6 : vector<8x128xf32>
    %c0_6 = arith.constant 0 : index
    %c0_7 = arith.constant 0 : index
    %8 = vector.load %arg4[%c0_6, %c0_7] : memref<128x128xf32, #tpu.memory_space<vmem>>, vector<128x128xf32>
    %cst_8 = arith.constant dense<0.000000e+00> : vector<8x128xf32>
    %9 = tpu.matmul %7, %8, %cst_8 {dimension_numbers = #tpu.dot_dimension_numbers<[1], [0], [0], [1], [0, 0, 1, 1], [], []>} : vector<8x128xf32>, vector<128x128xf32>, vector<8x128xf32> -> vector<8x128xf32>
    %c0_9 = arith.constant 0 : index
    %c0_10 = arith.constant 0 : index
    %10 = vector.load %arg5[%c0_9, %c0_10] : memref<1x128xf32, #tpu.memory_space<vmem>>, vector<1x128xf32>
    %11 = vector.broadcast %10 : vector<1x128xf32> to vector<8x128xf32>
    %12 = arith.addf %9, %11 : vector<8x128xf32>
    %cst_11 = arith.constant 0.000000e+00 : f32
    %13 = vector.broadcast %cst_11 : f32 to vector<8x128xf32>
    %14 = arith.maximumf %12, %13 : vector<8x128xf32>
    %c0_12 = arith.constant 0 : index
    %c0_13 = arith.constant 0 : index
    %c0_14 = arith.constant 0 : index
    %15 = vector.load %arg6[%c0_12, %c0_13, %c0_14] : memref<3x128x16xf32, #tpu.memory_space<vmem>>, vector<1x128x16xf32>
    %16 = vector.shape_cast %15 : vector<1x128x16xf32> to vector<128x16xf32>
    %cst_15 = arith.constant dense<0.000000e+00> : vector<8x16xf32>
    %17 = tpu.matmul %14, %16, %cst_15 {dimension_numbers = #tpu.dot_dimension_numbers<[1], [0], [0], [1], [0, 0, 1, 1], [], []>} : vector<8x128xf32>, vector<128x16xf32>, vector<8x16xf32> -> vector<8x16xf32>
    %c0_16 = arith.constant 0 : index
    %c0_17 = arith.constant 0 : index
    %c0_18 = arith.constant 0 : index
    %18 = vector.load %arg7[%c0_16, %c0_17, %c0_18] : memref<3x1x16xf32, #tpu.memory_space<vmem>>, vector<1x1x16xf32>
    %19 = vector.shape_cast %18 : vector<1x1x16xf32> to vector<1x16xf32>
    %20 = vector.broadcast %19 : vector<1x16xf32> to vector<8x16xf32>
    %21 = arith.addf %17, %20 : vector<8x16xf32>
    %c0_19 = arith.constant 0 : index
    %c0_20 = arith.constant 0 : index
    %c0_21 = arith.constant 0 : index
    %22 = vector.load %arg8[%c0_19, %c0_20, %c0_21] : memref<3x8x16xf32, #tpu.memory_space<vmem>>, vector<1x8x16xf32>
    %23 = vector.shape_cast %22 : vector<1x8x16xf32> to vector<8x16xf32>
    %24 = vector.shape_cast %21 : vector<8x16xf32> to vector<1x8x16xf32>
    tpu.vector_store %arg8[%c0_19, %c0_20, %c0_21], %24 {strides = array<i32>} : memref<3x8x16xf32, #tpu.memory_space<vmem>>, vector<1x8x16xf32>,
    %c1 = arith.constant 1 : index
    %c0_22 = arith.constant 0 : index
    %c0_23 = arith.constant 0 : index
    %25 = vector.load %arg6[%c1, %c0_22, %c0_23] : memref<3x128x16xf32, #tpu.memory_space<vmem>>, vector<1x128x16xf32>
    %26 = vector.shape_cast %25 : vector<1x128x16xf32> to vector<128x16xf32>
    %cst_24 = arith.constant dense<0.000000e+00> : vector<8x16xf32>
    %27 = tpu.matmul %14, %26, %cst_24 {dimension_numbers = #tpu.dot_dimension_numbers<[1], [0], [0], [1], [0, 0, 1, 1], [], []>} : vector<8x128xf32>, vector<128x16xf32>, vector<8x16xf32> -> vector<8x16xf32>
    %c1_25 = arith.constant 1 : index
    %c0_26 = arith.constant 0 : index
    %c0_27 = arith.constant 0 : index
    %28 = vector.load %arg7[%c1_25, %c0_26, %c0_27] : memref<3x1x16xf32, #tpu.memory_space<vmem>>, vector<1x1x16xf32>
    %29 = vector.shape_cast %28 : vector<1x1x16xf32> to vector<1x16xf32>
    %30 = vector.broadcast %29 : vector<1x16xf32> to vector<8x16xf32>
    %31 = arith.addf %27, %30 : vector<8x16xf32>
    %c1_28 = arith.constant 1 : index
    %c0_29 = arith.constant 0 : index
    %c0_30 = arith.constant 0 : index
    %32 = vector.load %arg8[%c1_28, %c0_29, %c0_30] : memref<3x8x16xf32, #tpu.memory_space<vmem>>, vector<1x8x16xf32>
    %33 = vector.shape_cast %32 : vector<1x8x16xf32> to vector<8x16xf32>
    %34 = vector.shape_cast %31 : vector<8x16xf32> to vector<1x8x16xf32>
    tpu.vector_store %arg8[%c1_28, %c0_29, %c0_30], %34 {strides = array<i32>} : memref<3x8x16xf32, #tpu.memory_space<vmem>>, vector<1x8x16xf32>,
    %c2 = arith.constant 2 : index
    %c0_31 = arith.constant 0 : index
    %c0_32 = arith.constant 0 : index
    %35 = vector.load %arg6[%c2, %c0_31, %c0_32] : memref<3x128x16xf32, #tpu.memory_space<vmem>>, vector<1x128x16xf32>
    %36 = vector.shape_cast %35 : vector<1x128x16xf32> to vector<128x16xf32>
    %cst_33 = arith.constant dense<0.000000e+00> : vector<8x16xf32>
    %37 = tpu.matmul %14, %36, %cst_33 {dimension_numbers = #tpu.dot_dimension_numbers<[1], [0], [0], [1], [0, 0, 1, 1], [], []>} : vector<8x128xf32>, vector<128x16xf32>, vector<8x16xf32> -> vector<8x16xf32>
    %c2_34 = arith.constant 2 : index
    %c0_35 = arith.constant 0 : index
    %c0_36 = arith.constant 0 : index
    %38 = vector.load %arg7[%c2_34, %c0_35, %c0_36] : memref<3x1x16xf32, #tpu.memory_space<vmem>>, vector<1x1x16xf32>
    %39 = vector.shape_cast %38 : vector<1x1x16xf32> to vector<1x16xf32>
    %40 = vector.broadcast %39 : vector<1x16xf32> to vector<8x16xf32>
    %41 = arith.addf %37, %40 : vector<8x16xf32>
    %c2_37 = arith.constant 2 : index
    %c0_38 = arith.constant 0 : index
    %c0_39 = arith.constant 0 : index
    %42 = vector.load %arg8[%c2_37, %c0_38, %c0_39] : memref<3x8x16xf32, #tpu.memory_space<vmem>>, vector<1x8x16xf32>
    %43 = vector.shape_cast %42 : vector<1x8x16xf32> to vector<8x16xf32>
    %44 = vector.shape_cast %41 : vector<8x16xf32> to vector<1x8x16xf32>
    tpu.vector_store %arg8[%c2_37, %c0_38, %c0_39], %44 {strides = array<i32>} : memref<3x8x16xf32, #tpu.memory_space<vmem>>, vector<1x8x16xf32>,
    return
  }
  func.func @transform_0(%arg0: i32) -> (i32, i32) {
    %c0_i32 = arith.constant 0 : i32
    %c0_i32_0 = arith.constant 0 : i32
    return %arg0, %c0_i32 : i32, i32
  }
  func.func @transform_1(%arg0: i32) -> (i32, i32) {
    %c0_i32 = arith.constant 0 : i32
    %c0_i32_0 = arith.constant 0 : i32
    %c0_i32_1 = arith.constant 0 : i32
    return %c0_i32, %c0_i32_0 : i32, i32
  }
  func.func @transform_2(%arg0: i32) -> (i32, i32) {
    %c0_i32 = arith.constant 0 : i32
    %c0_i32_0 = arith.constant 0 : i32
    %c0_i32_1 = arith.constant 0 : i32
    return %c0_i32, %c0_i32_0 : i32, i32
  }
  func.func @transform_3(%arg0: i32) -> (i32, i32) {
    %c0_i32 = arith.constant 0 : i32
    %c0_i32_0 = arith.constant 0 : i32
    %c0_i32_1 = arith.constant 0 : i32
    return %c0_i32, %c0_i32_0 : i32, i32
  }
  func.func @transform_4(%arg0: i32) -> (i32, i32) {
    %c0_i32 = arith.constant 0 : i32
    %c0_i32_0 = arith.constant 0 : i32
    %c0_i32_1 = arith.constant 0 : i32
    return %c0_i32, %c0_i32_0 : i32, i32
  }
  func.func @transform_5(%arg0: i32) -> (i32, i32, i32) {
    %c0_i32 = arith.constant 0 : i32
    %c0_i32_0 = arith.constant 0 : i32
    %c0_i32_1 = arith.constant 0 : i32
    %c0_i32_2 = arith.constant 0 : i32
    return %c0_i32, %c0_i32_0, %c0_i32_1 : i32, i32, i32
  }
  func.func @transform_6(%arg0: i32) -> (i32, i32, i32) {
    %c0_i32 = arith.constant 0 : i32
    %c0_i32_0 = arith.constant 0 : i32
    %c0_i32_1 = arith.constant 0 : i32
    %c0_i32_2 = arith.constant 0 : i32
    return %c0_i32, %c0_i32_0, %c0_i32_1 : i32, i32, i32
  }
  func.func @transform_7(%arg0: i32) -> (i32, i32, i32) {
    %c0_i32 = arith.constant 0 : i32
    %c0_i32_0 = arith.constant 0 : i32
    %c0_i32_1 = arith.constant 0 : i32
    return %c0_i32, %arg0, %c0_i32_0 : i32, i32, i32
  }
}

</mosaic_0001>

<bundles_post_ra>
// kernel: tpu_custom_call.1
= control target key start
LH: loop header
LB: loop body
LE: loop exit
PB: predicated region body
PF: predicated region fallthrough
CT: control target
= control target key end

     0   :  { %12 = vsyncpa [#allocation3], 0  ;;  %s1703_s0 = inlined_call_operand.vmem [shape: f32[16,16], index: 0, kind: input, shape index: {}]   ;;  %s1704_s1 = inlined_call_operand.vmem [shape: f32[16,128], index: 1, kind: input, shape index: {}]   ;;  %s1705_s2 = inlined_call_operand.vmem [shape: f32[1,128], index: 2, kind: input, shape index: {}]   ;;  %s1706_s3 = inlined_call_operand.vmem [shape: f32[128,128], index: 3, kind: input, shape index: {}]   ;;  %s1707_s4 = inlined_call_operand.vmem [shape: f32[1,128], index: 4, kind: input, shape index: {}]   ;;  %s1708_s5 = inlined_call_operand.vmem [shape: f32[3,128,16], index: 5, kind: input, shape index: {}]   ;;  %s1709_s6 = inlined_call_operand.vmem [shape: f32[3,1,16], index: 6, kind: input, shape index: {}]   ;;  %s1710_s7 = inlined_call_operand.hbm [shape: f32[3,16,16], index: 7, kind: output, shape index: {}]  }
   0x1   :  { %14 = vsyncpa [#allocation3 + $0x1], 0  ;;  %s1340_s24 = smov 0   ;;  %s1342_s25 = smov 0  }
   0x2   :  { %s1344_s26 = smov 0   ;;  %s1346_s27 = smov 0  }
   0x3 LB: > { %s1361_s28 = sadd.s32 4294967295, %s1291_s27   ;;  %s816_s29 = sadd.s32 4294967294, %s1291_s27   ;;  %s1291_s27 = sphi %s1346_s27, %s1716_s27   ;;  %s1287_s26 = sphi %s1344_s26, %s1715_s26   ;;  %s1283_s25 = sphi %s1342_s25, %s1714_s25   ;;  %s1279_s24 = sphi %s1340_s24, %s1713_s24  }
   0x4   : > { %s1365_s30 = sadd.s32 1, %s1291_s27   ;;  %s179_s8 = sadd.s32 1, %s1287_s26 }
   0x5   : > { %s176_s9 = ssub.s32 %s1291_s27, %s1365_s30  ;;  %p189_p0 = scmp.ne.s32.totalorder %s1287_s26, %s1283_s25 }
   0x6   : > { %p177_p1 = scmp.eq.s32.totalorder %s176_s9, 0  ;;  %p190_p2 = scmp.eq.s32.totalorder %s1361_s28, 1 }
   0x7   : > { %p195_p3 = scmp.ne.s32.totalorder %s1283_s25, %s1279_s24  ;;  %p196_p4 = scmp.eq.s32.totalorder %s816_s29, 1 }
   0x8   : > { %s1376_s10 = scalar_select %p177_p1, %s1287_s26, %s179_s8  }
   0x9   : > { %p1378_p5 = por %p190_p2, %p189_p0  ;;  %p1382_p6 = por %p196_p4, %p195_p3 }
   0xa   : > { %p819_p7 = scmp.ge.s32.totalorder %s1291_s27, 1  ;;  %p239_p8 = scmp.lt.s32.totalorder %s1291_s27, 3 }
   0xc   : > { %p240_p9 = pnand %p819_p7, %p239_p8 }
   0xd   : > { %v275_v0 = vld [vmem:[%s1704_s1] sm:$0xff] (!%p240_p9)  ;;  %v276_v1 = vld [vmem:[%s1704_s1 + $0x8] sm:$0xff] (!%p240_p9)  ;;  %p270_p10 = scmp.lt.s32.totalorder (!%p240_p9), %s1361_s28, 1  ;;  %v1293_v2 = vmov (!%p240_p9), 0.0|0.0   ;;  %vm1294_vm0 = vmmov (!%p240_p9), 0   ;;  %v1295_v4 = vmov (!%p240_p9), 0.0  }
   0xe   : > { %243 = sbr.rel (%p240_p9) target bundleno = 720 (0x2d0), region = 48  ;;  %1084 = vmatprep.subr.bf16.mxu0 (!%p240_p9), %v1293_v2  ;;  %v1085_v3 = vpack.c.bf16 (!%p240_p9), %v276_v1, %v275_v0  ;;  %941 = vmatprep.mubr.msk.f32.mxu0 (!%p240_p9), %vm1294_vm0, %v1295_v4  ;;  %v359_v5 = vld [vmem:[%s1706_s3] sm:$0xff] (!%p240_p9)  ;;  %v360_v6 = vld [vmem:[%s1706_s3 + $0x8] sm:$0xff] (!%p240_p9)  ;;  %v361_v7 = vld [vmem:[%s1706_s3 + $0x10] sm:$0xff] (!%p240_p9)  ;;  %vm284_vm1 = vcmask (!%p240_p9), 130048   ;;  %s267_s14 = sand.u32 (!%p240_p9), 1, %s1283_s25  }
   0xf   : > { %1087 = vmatprep.subr.bf16.mxu1 (!%p240_p9), %v1293_v2  ;;  %v1088_v8 = vpack.c.bf16 (!%p240_p9), %v360_v6, %v359_v5  ;;  %v362_v9 = vld [vmem:[%s1706_s3 + $0x18] sm:$0xff] (!%p240_p9)  ;;  %976 = vmatprep.mubr.msk.f32.mxu1 (!%p240_p9), %vm1294_vm0, %v1295_v4  ;;  %v363_v11 = vld [vmem:[%s1706_s3 + $0x20] sm:$0xff] (!%p240_p9)  ;;  %v364_v12 = vld [vmem:[%s1706_s3 + $0x28] sm:$0xff] (!%p240_p9)  ;;  %s863_s22 = sshll.u32 (!%p240_p9), %s1361_s28, 7  ;;  %s1296_s16 = smov (!%p240_p9), [#allocation2]  }
  0x10   : > { %1086 = vmatpush3.bf16.msra.mxu0 (!%p240_p9), %v1085_v3  ;;  %v1091_v10 = vpack.c.bf16 (!%p240_p9), %v362_v9, %v361_v7  ;;  %v1094_v14 = vpack.c.bf16 (!%p240_p9), %v364_v12, %v363_v11  ;;  %v365_v15 = vld [vmem:[%s1706_s3 + $0x30] sm:$0xff] (!%p240_p9)  ;;  %v366_v16 = vld [vmem:[%s1706_s3 + $0x38] sm:$0xff] (!%p240_p9)  ;;  %v367_v18 = vld [vmem:[%s1706_s3 + $0x40] sm:$0xff] (!%p240_p9)  ;;  %s1659_s13 = scalar_lea.hbm (!%p240_p9), %s1710_s7, %s863_s22  ;;  %s1233_s17 = sshll.u32 (!%p240_p9), %s1296_s16, 4  ;;  %s1234_s17 = int_to_ptr.vmem [resolvable:$false] %s1233_s17 }
  0x11   : > { %1089 = vmatpush3.bf16.msra.mxu1 (!%p240_p9), %v1088_v8  ;;  %1111 = vmatprep.subr.bf16.mxu0 (!%p240_p9), %v1293_v2  ;;  %v1097_v17 = vpack.c.bf16 (!%p240_p9), %v366_v16, %v365_v15  ;;  %v368_v19 = vld [vmem:[%s1706_s3 + $0x48] sm:$0xff] (!%p240_p9)  ;;  %v369_v21 = vld [vmem:[%s1706_s3 + $0x50] sm:$0xff] (!%p240_p9)  ;;  %v370_v22 = vld [vmem:[%s1706_s3 + $0x58] sm:$0xff] (!%p240_p9)  ;;  %s1235_s18 = scalar_lea.vmem (!%p240_p9), %s1234_s17, 768 }
  0x12   : > { %1090 = vmatprep.subr.bf16.mxu1 (!%p240_p9), %v1293_v2  ;;  %v1100_v20 = vpack.c.bf16 (!%p240_p9), %v368_v19, %v367_v18  ;;  %v1103_v23 = vpack.c.bf16 (!%p240_p9), %v370_v22, %v369_v21  ;;  %v371_v24 = vld [vmem:[%s1706_s3 + $0x60] sm:$0xff] (!%p240_p9)  ;;  %v372_v25 = vld [vmem:[%s1706_s3 + $0x68] sm:$0xff] (!%p240_p9)  ;;  %v373_v27 = vld [vmem:[%s1706_s3 + $0x70] sm:$0xff] (!%p240_p9) }
  0x13   : > { %v1106_v26 = vpack.c.bf16 (!%p240_p9), %v372_v25, %v371_v24  ;;  %v374_v28 = vld [vmem:[%s1706_s3 + $0x78] sm:$0xff] (!%p240_p9)  ;;  %v453_v30 = vld [vmem:[%s1708_s5] sm:$0xff] (!%p240_p9)  ;;  %v454_v31 = vld [vmem:[%s1708_s5 + $0x8] sm:$0xff] (!%p240_p9) }
  0x14   : > { %v1109_v29 = vpack.c.bf16 (!%p240_p9), %v374_v28, %v373_v27  ;;  %v1112_v32 = vpack.c.bf16 (!%p240_p9), %v454_v31, %v453_v30  ;;  %v455_v33 = vld [vmem:[%s1708_s5 + $0x10] sm:$0xff] (!%p240_p9)  ;;  %v456_v34 = vld [vmem:[%s1708_s5 + $0x18] sm:$0xff] (!%p240_p9)  ;;  %v457_v36 = vld [vmem:[%s1708_s5 + $0x20] sm:$0xff] (!%p240_p9) }
  0x15   : > { %s271_s23 = scalar_select %p270_p10, %s1361_s28, 1  ;;  %1092 = vmatpush3.bf16.msra.mxu1 %v1091_v10  ;;  %v1115_v35 = vpack.c.bf16 %v456_v34, %v455_v33  ;;  %v458_v37 = vld [vmem:[%s1708_s5 + $0x28] sm:$0xff]  ;;  %v459_v39 = vld [vmem:[%s1708_s5 + $0x30] sm:$0xff]  ;;  %v460_v40 = vld [vmem:[%s1708_s5 + $0x38] sm:$0xff] }
  0x16   : > { %1093 = vmatprep.subr.bf16.mxu1 %v1293_v2  ;;  %v1118_v38 = vpack.c.bf16 %v458_v37, %v457_v36  ;;  %v1121_v41 = vpack.c.bf16 %v460_v40, %v459_v39  ;;  %v461_v42 = vld [vmem:[%s1708_s5 + $0x40] sm:$0xff]  ;;  %v462_v43 = vld [vmem:[%s1708_s5 + $0x48] sm:$0xff]  ;;  %v463_v45 = vld [vmem:[%s1708_s5 + $0x50] sm:$0xff]  ;;  %s1662_s28 = scalar_lea.sflag [#allocation3], %s267_s14 }
  0x17   : > { %s820_s9 = sshll.u32 %s271_s23, 3  ;;  %v1124_v44 = vpack.c.bf16 %v462_v43, %v461_v42  ;;  %v464_v46 = vld [vmem:[%s1708_s5 + $0x58] sm:$0xff]  ;;  %v465_v48 = vld [vmem:[%s1708_s5 + $0x60] sm:$0xff]  ;;  %v466_v49 = vld [vmem:[%s1708_s5 + $0x68] sm:$0xff] }
  0x18   : > { %s273_s15 = scalar_lea.vmem %s1703_s0, %s820_s9  ;;  %v1127_v47 = vpack.c.bf16 %v464_v46, %v463_v45  ;;  %v1130_v50 = vpack.c.bf16 %v466_v49, %v465_v48  ;;  %v821_v51 = vld [vmem:[%s1705_s2] ss:$0 sm:$0xff]  ;;  %v826_v53 = vld [vmem:[%s1708_s5 + $0x88] sm:$0xff]  ;;  %v827_v59 = vld [vmem:[%s1708_s5 + $0x90] sm:$0xff] }
  0x19   : > { %v274_v13 = vld [vmem:[%s273_s15] sm:$0xff]  ;;  %1095 = vmatpush3.bf16.msra.mxu1 %v1094_v14  ;;  %v828_v60 = vld [vmem:[%s1708_s5 + $0x98] sm:$0xff]  ;;  %v830_v63 = vld [vmem:[%s1708_s5 + $0xa8] sm:$0xff]  ;;  %s1183_s15 = smul.u32 24, %s267_s14 }
  0x1a   : > { %942 = vmatmul.mubr.msk.f32.vlgmr.msra.gmra.mrb[0].mxu0 %vm284_vm1, %v274_v13  ;;  %1096 = vmatprep.subr.bf16.mxu1 %v1293_v2  ;;  %v825_v52 = vld [vmem:[%s1708_s5 + $0x80] sm:$0xff]  ;;  %v1139_v61 = vpack.c.bf16 %v828_v60, %v827_v59  ;;  %v831_v1 = vld [vmem:[%s1708_s5 + $0xb0] sm:$0xff]  ;;  %v832_v3 = vld [vmem:[%s1708_s5 + $0xb8] sm:$0xff] }
  0x1b   : > { %1011 = vmatprep.mubr.msk.f32.mxu0 %vm1294_vm0, %v1295_v4  ;;  %1113 = vmatpush3.bf16.msra.mxu0 %v1112_v32  ;;  %v1136_v57 = vpack.c.bf16 %v826_v53, %v825_v52  ;;  %v829_v62 = vld [vmem:[%s1708_s5 + $0xa0] sm:$0xff]  ;;  %v1145_v5 = vpack.c.bf16 %v832_v3, %v831_v1  ;;  %v834_v7 = vld [vmem:[%s1708_s5 + $0xc8] sm:$0xff]  ;;  %v835_v9 = vld [vmem:[%s1708_s5 + $0xd0] sm:$0xff]  ;;  %s269_s20 = scalar_lea.vmem [#allocation2], %s1183_s15 }
  0x1c   : > { %1114 = vmatprep.subr.bf16.mxu0 %v1293_v2  ;;  %v1142_v0 = vpack.c.bf16 %v830_v63, %v829_v62  ;;  %v833_v6 = vld [vmem:[%s1708_s5 + $0xc0] sm:$0xff]  ;;  %v836_v10 = vld [vmem:[%s1708_s5 + $0xd8] sm:$0xff]  ;;  %v838_v13 = vld [vmem:[%s1708_s5 + $0xe8] sm:$0xff]  ;;  %s754_s21 = sshll.u32 %s269_s20, 4  ;;  %s1654_s21 = int_to_ptr.vmem [resolvable:$true] %s754_s21 }
  0x1d   : > { %1098 = vmatpush3.bf16.msra.mxu1 %v1097_v17  ;;  %v1148_v8 = vpack.c.bf16 %v834_v7, %v833_v6  ;;  %v1151_v11 = vpack.c.bf16 %v836_v10, %v835_v9  ;;  %v837_v12 = vld [vmem:[%s1708_s5 + $0xe0] sm:$0xff]  ;;  %v467_v15 = vld [vmem:[%s1708_s5 + $0x70] sm:$0xff]  ;;  %v468_v16 = vld [vmem:[%s1708_s5 + $0x78] sm:$0xff]  ;;  %s1229_s15 = scalar_lea.vmem %s1654_s21, 384  ;;  %p1236_p0 = scmp.lt.s32.totalorder %s1654_s21, %s1234_s17 }
  0x1e   : > { %1099 = vmatprep.subr.bf16.mxu1 %v1293_v2  ;;  %v1154_v14 = vpack.c.bf16 %v838_v13, %v837_v12  ;;  %v1133_v17 = vpack.c.bf16 %v468_v16, %v467_v15  ;;  %v839_v18 = vld [vmem:[%s1708_s5 + $0xf0] sm:$0xff]  ;;  %v840_v19 = vld [vmem:[%s1708_s5 + $0xf8] sm:$0xff]  ;;  %v823_v21 = vld [vmem:[%s1707_s4] ss:$0 sm:$0xff]  ;;  %p1230_p11 = scmp.ne.s32.totalorder %s1654_s21, %s1229_s15  ;;  %p1237_p1 = scmp.lt.s32.totalorder %s1235_s18, %s1229_s15 }
  0x1f   : > { %1116 = vmatpush3.bf16.msra.mxu0 %v1115_v35  ;;  %v844_v22 = vld [vmem:[%s1708_s5 + $0x100] sm:$0xff]  ;;  %v847_v30 = vld [vmem:[%s1708_s5 + $0x118] sm:$0xff]  ;;  %v849_v33 = vld [vmem:[%s1708_s5 + $0x128] sm:$0xff] }
  0x20   : > { %1117 = vmatprep.subr.bf16.mxu0 %v1293_v2  ;;  %v848_v32 = vld [vmem:[%s1708_s5 + $0x120] sm:$0xff]  ;;  %v850_v35 = vld [vmem:[%s1708_s5 + $0x130] sm:$0xff]  ;;  %p1231_p12 = pnand %p1230_p11, %p1378_p5  ;;  %p1238_p2 = por %p1237_p1, %p1236_p0 }
  0x21   : > { %1101 = vmatpush3.bf16.msra.mxu1 %v1100_v20  ;;  %v1157_v20 = vpack.c.bf16 %v840_v19, %v839_v18  ;;  %v1166_v34 = vpack.c.bf16 %v849_v33, %v848_v32  ;;  %v852_v37 = vld [vmem:[%s1708_s5 + $0x140] sm:$0xff]  ;;  %v854_v40 = vld [vmem:[%s1708_s5 + $0x150] sm:$0xff] }
  0x22   : > { %1102 = vmatprep.subr.bf16.mxu1 %v1293_v2  ;;  %v856_v43 = vld [vmem:[%s1708_s5 + $0x160] sm:$0xff]  ;;  %v858_v46 = vld [vmem:[%s1708_s5 + $0x170] sm:$0xff]  ;;  %p1232_p13 = pneg %p1231_p12 }
  0x23   : > { %1119 = vmatpush3.bf16.msra.mxu0 %v1118_v38  ;;  %v853_v38 = vld [vmem:[%s1708_s5 + $0x148] sm:$0xff]  ;;  %v824_v49 = vld [vmem:[%s1709_s6] ss:$0 sm:$0xff] }
  0x24   : > { %1120 = vmatprep.subr.bf16.mxu0 %v1293_v2  ;;  %v1172_v39 = vpack.c.bf16 %v853_v38, %v852_v37  ;;  %p1239_p3 = pnand %p1238_p2, %p1232_p13 }
  0x25   : > { %1104 = vmatpush3.bf16.msra.mxu1 %v1103_v23  ;;  %v845_v23 = vld [vmem:[%s1708_s5 + $0x108] sm:$0xff] }
  0x26   : > { %1105 = vmatprep.subr.bf16.mxu1 %v1293_v2  ;;  %v1160_v27 = vpack.c.bf16 %v845_v23, %v844_v22 }
  0x27   : > { %1122 = vmatpush3.bf16.msra.mxu0 %v1121_v41  ;;  %v855_v41 = vld [vmem:[%s1708_s5 + $0x158] sm:$0xff] }
  0x28   : > { %1123 = vmatprep.subr.bf16.mxu0 %v1293_v2  ;;  %v1175_v42 = vpack.c.bf16 %v855_v41, %v854_v40 }
  0x29   : > { %1107 = vmatpush3.bf16.msra.mxu1 %v1106_v26 }
  0x2a   : > { %1108 = vmatprep.subr.bf16.mxu1 %v1293_v2 }
  0x2b   : > { %1125 = vmatpush3.bf16.msra.mxu0 %v1124_v44  ;;  %v857_v44 = vld [vmem:[%s1708_s5 + $0x168] sm:$0xff] }
  0x2c   : > { %1126 = vmatprep.subr.bf16.mxu0 %v1293_v2  ;;  %v1178_v45 = vpack.c.bf16 %v857_v44, %v856_v43 }
  0x2d   : > { %1110 = vmatpush3.bf16.msra.mxu1 %v1109_v29  ;;  %v846_v29 = vld [vmem:[%s1708_s5 + $0x110] sm:$0xff] }
  0x2e   : > { %1135 = vmatprep.subr.bf16.mxu1 %v1293_v2  ;;  %v1163_v31 = vpack.c.bf16 %v847_v30, %v846_v29 }
  0x2f   : > { %1128 = vmatpush3.bf16.msra.mxu0 %v1127_v47  ;;  %v859_v47 = vld [vmem:[%s1708_s5 + $0x178] sm:$0xff] }
  0x30   : > { %1129 = vmatprep.subr.bf16.mxu0 %v1293_v2  ;;  %v1181_v48 = vpack.c.bf16 %v859_v47, %v858_v46 }
  0x33   : > { %1131 = vmatpush3.bf16.msra.mxu0 %v1130_v50  ;;  %v842_v50 = vld [vmem:[%s1709_s6 + $0x1] ss:$0 sm:$0xff] }
  0x34   : > { %1132 = vmatprep.subr.bf16.mxu0 %v1293_v2 }
  0x37   : > { %1134 = vmatpush3.bf16.msra.mxu0 %v1133_v17 }
  0x38   : > { %1159 = vmatprep.subr.bf16.mxu0 %v1293_v2 }
  0xed   : > { %v354_v54 = vpop.f32.mrb[0].mxu0 }
  0xee   : > { %v355_v55 = vadd.f32 %v821_v51, %v354_v54  ;;  %v943_v56 = vpop.f32.mrb[1].mxu0 }
  0xf0   : > { %v358_v58 = vmax.f32 %v355_v55, 0.0 }
  0xf2   : > { %977 = vmatmul.mubr.f32.vlgmr.msra.gmra.mrb[0].mxu1 %v358_v58 }
  0xf3   : > { %1137 = vmatpush3.bf16.msra.mxu1 %v1136_v57  ;;  %1046 = vmatprep.mubr.msk.f32.mxu1 %vm1294_vm0, %v1295_v4 }
  0xf4   : > { %1138 = vmatprep.subr.bf16.mxu1 %v1293_v2 }
  0xf7   : > { %1140 = vmatpush3.bf16.msra.mxu1 %v1139_v61 }
  0xf8   : > { %1141 = vmatprep.subr.bf16.mxu1 %v1293_v2 }
  0xfb   : > { %1143 = vmatpush3.bf16.msra.mxu1 %v1142_v0 }
  0xfc   : > { %1144 = vmatprep.subr.bf16.mxu1 %v1293_v2 }
  0xff   : > { %1146 = vmatpush3.bf16.msra.mxu1 %v1145_v5 }
 0x100   : > { %1147 = vmatprep.subr.bf16.mxu1 %v1293_v2 }
 0x103   : > { %1149 = vmatpush3.bf16.msra.mxu1 %v1148_v8 }
 0x104   : > { %1150 = vmatprep.subr.bf16.mxu1 %v1293_v2 }
 0x107   : > { %1152 = vmatpush3.bf16.msra.mxu1 %v1151_v11 }
 0x108   : > { %1153 = vmatprep.subr.bf16.mxu1 %v1293_v2 }
 0x10b   : > { %1155 = vmatpush3.bf16.msra.mxu1 %v1154_v14 }
 0x10c   : > { %1156 = vmatprep.subr.bf16.mxu1 %v1293_v2 }
 0x10f   : > { %1158 = vmatpush3.bf16.msra.mxu1 %v1157_v20 }
 0x1c5   : > { %v448_v24 = vpop.f32.mrb[0].mxu1 }
 0x1c6   : > { %v449_v25 = vadd.f32 %v823_v21, %v448_v24  ;;  %v978_v26 = vpop.f32.mrb[1].mxu1 }
 0x1c8   : > { %v452_v28 = vmax.f32 %v449_v25, 0.0 }
 0x1ca   : > { %1012 = vmatmul.mubr.f32.vlgmr.msra.gmra.mrb[2].mxu0 %v452_v28  ;;  %1047 = vmatmul.mubr.f32.vlgmr.msra.gmra.mrb[2].mxu1 %v452_v28 }
 0x1cb   : > { %1161 = vmatpush3.bf16.msra.mxu0 %v1160_v27  ;;  %1081 = vmatprep.mubr.msk.f32.mxu0 %vm1294_vm0, %v1295_v4  ;;  %v851_v4 = vld [vmem:[%s1708_s5 + $0x138] sm:$0xff] }
 0x1cc   : > { %1162 = vmatprep.subr.bf16.mxu0 %v1293_v2  ;;  %v1169_v36 = vpack.c.bf16 %v851_v4, %v850_v35 }
 0x1cf   : > { %1164 = vmatpush3.bf16.msra.mxu0 %v1163_v31 }
 0x1d0   : > { %1165 = vmatprep.subr.bf16.mxu0 %v1293_v2 }
 0x1d3   : > { %1167 = vmatpush3.bf16.msra.mxu0 %v1166_v34 }
 0x1d4   : > { %1168 = vmatprep.subr.bf16.mxu0 %v1293_v2 }
 0x1d7   : > { %1170 = vmatpush3.bf16.msra.mxu0 %v1169_v36 }
 0x1d8   : > { %1171 = vmatprep.subr.bf16.mxu0 %v1293_v2 }
 0x1db   : > { %1173 = vmatpush3.bf16.msra.mxu0 %v1172_v39 }
 0x1dc   : > { %1174 = vmatprep.subr.bf16.mxu0 %v1293_v2 }
 0x1df   : > { %1176 = vmatpush3.bf16.msra.mxu0 %v1175_v42 }
 0x1e0   : > { %1177 = vmatprep.subr.bf16.mxu0 %v1293_v2 }
 0x1e3   : > { %1179 = vmatpush3.bf16.msra.mxu0 %v1178_v45 }
 0x1e4   : > { %1180 = vmatprep.subr.bf16.mxu0 %v1293_v2  ;;  %v861_v2 = vld [vmem:[%s1709_s6 + $0x2] ss:$0 sm:$0xff] }
 0x1e7   : > { %1182 = vmatpush3.bf16.msra.mxu0 %v1181_v48 }
 0x1ea   : > { %1082 = vmatmul.mubr.f32.vlgmr.msra.gmra.mrb[4].mxu0 %v452_v28 }
 0x29d   : > { %v542_v51 = vpop.f32.mrb[2].mxu0  ;;  %v638_v52 = vpop.f32.mrb[2].mxu1 }
 0x29e   : > { %v543_v53 = vadd.f32 %v824_v49, %v542_v51  ;;  %v639_v54 = vadd.f32 %v842_v50, %v638_v52  ;;  %v1013_v55 = vpop.f32.mrb[3].mxu0  ;;  %v1048_v56 = vpop.f32.mrb[3].mxu1 }
 0x2a0   : > { %546 = vst.msk [vmem:[%s269_s20] sm:$0xff] %vm284_vm1, %v543_v53  ;;  %843 = vst.msk [vmem:[%s269_s20 + $0x8] sm:$0xff] %vm284_vm1, %v639_v54 }
 0x2bd   : > { %v735_v57 = vpop.f32.mrb[4].mxu0 }
 0x2be   : > { %v736_v58 = vadd.f32 %v861_v2, %v735_v57  ;;  %v1083_v59 = vpop.f32.mrb[5].mxu0 }
 0x2c0   : > { %862 = vst.msk [vmem:[%s269_s20 + $0x10] sm:$0xff] %vm284_vm1, %v736_v58 }
 0x2c1   : > { %1242 = shalt.err (!%p1239_p3)
}
 0x2c2   : > { %s1243_s14 = scalar_lea.hbm %s1659_s13, 384  ;;  %s1247_s22 = scalar_lea.hbm %s1710_s7, 768 }
 0x2c3   : > { %p1244_p4 = scmp.ne.s32.totalorder %s1659_s13, %s1243_s14  ;;  %p1248_p9 = scmp.lt.u32.totalorder %s1659_s13, %s1710_s7 }
 0x2c4   : > { %p1249_p10 = scmp.lt.u32.totalorder %s1247_s22, %s1243_s14  ;;  %p1251_p12 = scmp.lt.u32.totalorder %s1243_s14, %s1659_s13 }
 0x2c5   : > { %p1245_p7 = pnand %p1244_p4, %p1378_p5 }
 0x2c6   : > { %p1250_p11 = por %p1249_p10, %p1248_p9 }
 0x2c7   : > { %p1246_p8 = pneg %p1245_p7 }
 0x2c8   : > { %p1252_p13 = por %p1251_p12, %p1250_p11 }
 0x2ca   : > { %p1253_p0 = pnand %p1252_p13, %p1246_p8 }
 0x2cc   : > { %1256 = shalt.err (!%p1253_p0)
}
 0x2cd   : > { %s1297_s8 = smov 128   ;;  %s1298_s9 = smov 256  }
 0x2ce   : > { %s1299_s15 = smov 8  }
 0x2cf   : > { %1184 = dma.vmem_to_hbm [thread:$0]  (%p1378_p5), %s1654_s21, 384, %s1659_s13, %s1662_s28, %s1297_s8, %s1298_s9, %s1299_s15  }
 0x2d0 PF: > { %p1190_p1 = scmp.ge.s32.totalorder %s1291_s27, 2  ;;  %s769_s16 = sand.u32 1, %s1279_s24  }
 0x2d1   : > { %s770_s17 = scalar_lea.sflag [#allocation3], %s769_s16 }
 0x2d2   : > { %p1187_p2 = pnand %p1190_p1, %p1382_p6 }
 0x2d4   : > { %1274 = dma.done.wait (!%p1187_p2), %s770_s17, 384  }
 0x2d5   : > { %1276 = vsyncadd (!%p1187_p2), %s770_s17, 4294966912  ;;  %p17_p3 = scmp.ge.s32.totalorder %s1365_s30, 4   ;;  %s1713_s24 = smov %s1283_s25 }
 0x2d6   : > { %s1714_s25 = smov %s1287_s26  ;;  %s1715_s26 = smov %s1376_s10 }
 0x2d7   : > { %s1716_s27 = smov %s1365_s30  ;;  %19 = sbr.rel (!%p17_p3) target bundleno = 3 (0x3), region = 89 }
 0x2de   :  { %775 = vsyncpa [#allocation3], 1 }
 0x2df   :  { %777 = vsyncpa [#allocation3 + $0x1], 1 }

</bundles_post_ra>
